<compile_context>
chip_gen: v6e
topology: v6e:2x2x1
jax: 0.10.0
libtpu: 0.0.40
codegen_flags: <defaults>
</compile_context>

<pallas_src>
import math

import jax
import jax.numpy as jnp
from jax.experimental import pallas as pl
from jax.experimental.pallas import tpu as pltpu


def _garo_kernel(x_ref, m_ref, u_ref, v_ref, c_ref, s_ref, e_ref, p_ref,
                 out_ref, attn_ref):
    # x_ref: (TBt, N*C); m_ref: (N*C, N*C); u/v: (1, N*C); c: (1, N)
    # s_ref: (N*C, N); e_ref: (N, N*C); p_ref: (N*C, C)
    # out_ref: (TBt, C); attn_ref: (TBt, N)
    xin = x_ref[...]                           # (TBt, N*C) compute dtype
    xf = xin.astype(jnp.float32)               # f32 copy for VPU muls

    # q2[t, n*C + c] = scale * (embed_query(x_mean[t]) @ Wk)[c]  (same for all n)
    # One big lane-dense MXU matmul, K = N*C = 256.
    q2 = jnp.dot(xin, m_ref[...],
                 preferred_element_type=jnp.float32) + u_ref[...]     # (TBt, N*C)

    # Per-row additive bias: scale * embed_query(x_mean[t]) . bk (c0 part in c_ref).
    bias = jnp.sum(xf * v_ref[...], axis=-1, keepdims=True)           # (TBt, 1)

    # Segmented per-node reduce over each node's C channels via the MXU (K=256).
    scores = (jnp.dot(xf * q2, s_ref[...],
                      preferred_element_type=jnp.float32)
              + bias + c_ref[...])                                     # (TBt, N)
    attn = jax.nn.sigmoid(scores)                                      # (TBt, N)

    # TODO(synk): training-mode dropout on attn not implemented (identity at eval).

    # Broadcast attn back to the lane-dense (TBt, N*C) form (E = S^T), then do
    # the attention-weighted node mean as one (N*C -> C) matmul (1/N in P).
    attn_tiled = jnp.dot(attn, e_ref[...],
                         preferred_element_type=jnp.float32)           # (TBt, N*C)
    pooled = jnp.dot(xf * attn_tiled, p_ref[...],
                     preferred_element_type=jnp.float32)               # (TBt, C)

    out_ref[...] = pooled.astype(out_ref.dtype)
    attn_ref[...] = attn.astype(attn_ref.dtype)


def garo_forward(x, wq, bq, wk, bk, *, tb_tile=2048, compute_dtype=jnp.bfloat16):
    """Pallas implementation of ModuleGARO.forward(x, node_axis=2), eval mode.

    Args:
      x:  (T, B, N, C) float32
      wq: (C', C), bq: (C',)   -- embed_query weights (nn.Linear convention)
      wk: (C', C), bk: (C',)   -- embed_key weights
      tb_tile: fused (T*B) rows per grid block.
      compute_dtype: dtype for the x HBM stream / big matmul (bf16 default;
        use jnp.float32 for exact f32 parity).
    Returns:
      pooled: (T, B, C) = mean over nodes of attention-weighted x
      attn:   (B, T, N) = x_graphattention.permute(1, 0, 2)
    """
    f32 = jnp.float32
    T, B, N, C = x.shape
    Cp = wq.shape[0]
    NC = N * C
    TB = T * B
    scale = 1.0 / math.sqrt(Cp)

    # ---- Host-side algebraic folding (Wk folded into the query path) --------
    wqT = wq.T.astype(f32)                               # (C, C')
    wk32 = wk.astype(f32)                                # (C', C)
    m_core = (scale / N) * (wqT @ wk32)                  # (C, C)
    m_tiled = jnp.tile(m_core, (N, N)).astype(compute_dtype)        # (NC, NC)
    u_row = jnp.tile(scale * (bq.astype(f32) @ wk32), N).reshape(1, NC)
    v_row = jnp.tile((scale / N) * (wqT @ bk.astype(f32)), N).reshape(1, NC)
    c_row = jnp.full((1, N), scale * jnp.dot(bq.astype(f32), bk.astype(f32)), f32)

    # Selection / pooling matrices (exact 0/1 and 1/N entries, kept in f32).
    s_mat = jnp.repeat(jnp.eye(N, dtype=f32), C, axis=0)            # (NC, N)
    e_mat = s_mat.T                                                  # (N, NC)
    p_mat = jnp.tile(jnp.eye(C, dtype=f32), (N, 1)) / N              # (NC, C)

    # ---- Tile sizing ---------------------------------------------------------
    # Keep >= 2 grid steps when there's enough work so the 'parallel' axis can
    # shard across TensorCores (v7x megacore), and keep tiles sublane-aligned.
    if TB >= 2048:
        tb_tile = min(tb_tile, pl.cdiv(TB, 2))
    tb_tile = min(tb_tile, TB)
    if tb_tile < TB:
        tb_tile = max(8, (tb_tile // 8) * 8)
    tb_pad = pl.cdiv(TB, tb_tile) * tb_tile

    # Lane-dense, contiguous reshape of x: (T, B, N, C) -> (T*B, N*C).
    x2 = x.reshape(TB, NC).astype(compute_dtype)
    if tb_pad != TB:
        x2 = jnp.pad(x2, ((0, tb_pad - TB), (0, 0)))

    grid = (tb_pad // tb_tile,)
    const = lambda i: (0, 0)   # weights stay VMEM-resident across grid steps

    pooled, attn = pl.pallas_call(
        _garo_kernel,
        out_shape=(
            jax.ShapeDtypeStruct((tb_pad, C), f32),
            jax.ShapeDtypeStruct((tb_pad, N), f32),
        ),
        grid_spec=pltpu.PrefetchScalarGridSpec(
            num_scalar_prefetch=0,
            grid=grid,
            in_specs=[
                pl.BlockSpec((tb_tile, NC), lambda i: (i, 0)),   # x slab
                pl.BlockSpec((NC, NC), const),                   # M (folded Wq^T Wk)
                pl.BlockSpec((1, NC), const),                    # u
                pl.BlockSpec((1, NC), const),                    # v
                pl.BlockSpec((1, N), const),                     # c0 broadcast row
                pl.BlockSpec((NC, N), const),                    # S
                pl.BlockSpec((N, NC), const),                    # E = S^T
                pl.BlockSpec((NC, C), const),                    # P (1/N pooling)
            ],
            out_specs=[
                pl.BlockSpec((tb_tile, C), lambda i: (i, 0)),
                pl.BlockSpec((tb_tile, N), lambda i: (i, 0)),
            ],
        ),
        compiler_params=pltpu.CompilerParams(
            dimension_semantics=("parallel",),
            vmem_limit_bytes=32 * 1024 * 1024,
        ),
    )(x2, m_tiled, u_row, v_row, c_row, s_mat, e_mat, p_mat)

    pooled = pooled[:TB].reshape(T, B, C)
    attn = attn[:TB].reshape(T, B, N)
    return pooled, jnp.transpose(attn, (1, 0, 2))        # (B, T, N)


def garo_reference(x, wq, bq, wk, bk):
    """Pure-JAX reference mirroring the PyTorch forward (node_axis=2, eval mode)."""
    x_q = jnp.mean(x, axis=2, keepdims=True) @ wq.T + bq             # (T, B, 1, C')
    x_k = x @ wk.T + bk                                              # (T, B, N, C')
    scores = jnp.einsum("tbqc,tbnc->tbqn", x_q, x_k) / jnp.sqrt(
        jnp.float32(x_q.shape[-1]))
    attn = jax.nn.sigmoid(scores)[:, :, 0, :]                        # (T, B, N)
    pooled = jnp.mean(x * attn[..., None], axis=2)                   # (T, B, C)
    return pooled, jnp.transpose(attn, (1, 0, 2))


if __name__ == "__main__":
    # Small shapes: T=4 time steps, B=2 batch, N=8 nodes, hidden_dim=C=32,
    # upscale=1.0 -> C'=32.
    T, B, N, C = 4, 2, 8, 32
    Cp = C  # round(1.0 * C)

    key = jax.random.PRNGKey(0)
    kx, kwq, kbq, kwk, kbk = jax.random.split(key, 5)

    x = jax.random.normal(kx, (T, B, N, C), dtype=jnp.float32)

    # Deterministic nn.Linear-style init: U(-1/sqrt(fan_in), 1/sqrt(fan_in)).
    bound = 1.0 / math.sqrt(C)
    wq = jax.random.uniform(kwq, (Cp, C), jnp.float32, -bound, bound)
    bq = jax.random.uniform(kbq, (Cp,), jnp.float32, -bound, bound)
    wk = jax.random.uniform(kwk, (Cp, C), jnp.float32, -bound, bound)
    bk = jax.random.uniform(kbk, (Cp,), jnp.float32, -bound, bound)

    pooled_ref, attn_ref = garo_reference(x, wq, bq, wk, bk)

    # f32 parity path (exact-math layout/fold check).
    pooled32, attn32 = garo_forward(x, wq, bq, wk, bk, compute_dtype=jnp.float32)
    jax.block_until_ready((pooled32, attn32))
    assert pooled32.shape == (T, B, C) and attn32.shape == (B, T, N)
    assert jnp.allclose(pooled32, pooled_ref, atol=2e-5, rtol=2e-5)
    assert jnp.allclose(attn32, attn_ref, atol=2e-5, rtol=2e-5)

    # bf16 fast path (default): halves the HBM x stream; f32 accumulation.
    pooled16, attn16 = garo_forward(x, wq, bq, wk, bk)
    jax.block_until_ready((pooled16, attn16))
    assert pooled16.shape == (T, B, C) and attn16.shape == (B, T, N)
    assert jnp.allclose(pooled16, pooled_ref, atol=2e-2, rtol=2e-2)
    assert jnp.allclose(attn16, attn_ref, atol=2e-2, rtol=2e-2)

    print("KERNEL_OK")
</pallas_src>

<mosaic_0001>
module attributes {stable_mosaic.version = 11 : i64} {
  func.func @_garo_kernel(%arg0: i32, %arg1: memref<8x256xf32, #tpu.memory_space<vmem>>, %arg2: memref<256x256xf32, #tpu.memory_space<vmem>>, %arg3: memref<1x256xf32, #tpu.memory_space<vmem>>, %arg4: memref<1x256xf32, #tpu.memory_space<vmem>>, %arg5: memref<1x8xf32, #tpu.memory_space<vmem>>, %arg6: memref<256x8xf32, #tpu.memory_space<vmem>>, %arg7: memref<8x256xf32, #tpu.memory_space<vmem>>, %arg8: memref<256x32xf32, #tpu.memory_space<vmem>>, %arg9: memref<8x32xf32, #tpu.memory_space<vmem>>, %arg10: memref<8x8xf32, #tpu.memory_space<vmem>>) attributes {dimension_semantics = [#tpu.dimension_semantics<parallel>], iteration_bounds = array<i64: 1>, scalar_prefetch = 0 : i64, scratch_operands = 0 : i64, tpu.core_type = #tpu.core_type<tc>, window_params = [{transform_indices = @transform_0, window_bounds = array<i64: 8, 256>}, {pipeline_mode = #tpu.pipeline_mode<synchronous>, transform_indices = @transform_1, window_bounds = array<i64: 256, 256>}, {pipeline_mode = #tpu.pipeline_mode<synchronous>, transform_indices = @transform_2, window_bounds = array<i64: 1, 256>}, {pipeline_mode = #tpu.pipeline_mode<synchronous>, transform_indices = @transform_3, window_bounds = array<i64: 1, 256>}, {pipeline_mode = #tpu.pipeline_mode<synchronous>, transform_indices = @transform_4, window_bounds = array<i64: 1, 8>}, {pipeline_mode = #tpu.pipeline_mode<synchronous>, transform_indices = @transform_5, window_bounds = array<i64: 256, 8>}, {pipeline_mode = #tpu.pipeline_mode<synchronous>, transform_indices = @transform_6, window_bounds = array<i64: 8, 256>}, {pipeline_mode = #tpu.pipeline_mode<synchronous>, transform_indices = @transform_7, window_bounds = array<i64: 256, 32>}, {transform_indices = @transform_8, window_bounds = array<i64: 8, 32>}, {transform_indices = @transform_9, window_bounds = array<i64: 8, 8>}]} {
    %c0 = arith.constant 0 : index
    %c0_0 = arith.constant 0 : index
    %0 = vector.load %arg1[%c0, %c0_0] : memref<8x256xf32, #tpu.memory_space<vmem>>, vector<8x256xf32>
    %c0_1 = arith.constant 0 : index
    %c0_2 = arith.constant 0 : index
    %1 = vector.load %arg2[%c0_1, %c0_2] : memref<256x256xf32, #tpu.memory_space<vmem>>, vector<256x256xf32>
    %cst = arith.constant dense<0.000000e+00> : vector<8x256xf32>
    %2 = tpu.matmul %0, %1, %cst {dimension_numbers = #tpu.dot_dimension_numbers<[1], [0], [0], [1], [0, 0, 1, 1], [], []>} : vector<8x256xf32>, vector<256x256xf32>, vector<8x256xf32> -> vector<8x256xf32>
    %c0_3 = arith.constant 0 : index
    %c0_4 = arith.constant 0 : index
    %3 = vector.load %arg3[%c0_3, %c0_4] : memref<1x256xf32, #tpu.memory_space<vmem>>, vector<1x256xf32>
    %4 = vector.broadcast %3 : vector<1x256xf32> to vector<8x256xf32>
    %5 = arith.addf %2, %4 : vector<8x256xf32>
    %c0_5 = arith.constant 0 : index
    %c0_6 = arith.constant 0 : index
    %6 = vector.load %arg4[%c0_5, %c0_6] : memref<1x256xf32, #tpu.memory_space<vmem>>, vector<1x256xf32>
    %7 = vector.broadcast %6 : vector<1x256xf32> to vector<8x256xf32>
    %8 = arith.mulf %0, %7 : vector<8x256xf32>
    %cst_7 = arith.constant dense<0.000000e+00> : vector<8xf32>
    %9 = vector.multi_reduction <add>, %8, %cst_7 [1] : vector<8x256xf32> to vector<8xf32>
    %10 = vector.shape_cast %9 : vector<8xf32> to vector<8x1xf32>
    %11 = arith.mulf %0, %5 : vector<8x256xf32>
    %c0_8 = arith.constant 0 : index
    %c0_9 = arith.constant 0 : index
    %12 = vector.load %arg6[%c0_8, %c0_9] : memref<256x8xf32, #tpu.memory_space<vmem>>, vector<256x8xf32>
    %cst_10 = arith.constant dense<0.000000e+00> : vector<8x8xf32>
    %13 = tpu.matmul %11, %12, %cst_10 {dimension_numbers = #tpu.dot_dimension_numbers<[1], [0], [0], [1], [0, 0, 1, 1], [], []>} : vector<8x256xf32>, vector<256x8xf32>, vector<8x8xf32> -> vector<8x8xf32>
    %14 = vector.broadcast %10 : vector<8x1xf32> to vector<8x8xf32>
    %15 = arith.addf %13, %14 : vector<8x8xf32>
    %c0_11 = arith.constant 0 : index
    %c0_12 = arith.constant 0 : index
    %16 = vector.load %arg5[%c0_11, %c0_12] : memref<1x8xf32, #tpu.memory_space<vmem>>, vector<1x8xf32>
    %17 = vector.broadcast %16 : vector<1x8xf32> to vector<8x8xf32>
    %18 = arith.addf %15, %17 : vector<8x8xf32>
    %19 = arith.negf %18 : vector<8x8xf32>
    %20 = math.exp %19 : vector<8x8xf32>
    %cst_13 = arith.constant 1.000000e+00 : f32
    %21 = vector.broadcast %cst_13 : f32 to vector<8x8xf32>
    %22 = arith.addf %21, %20 : vector<8x8xf32>
    %23 = arith.divf %21, %22 : vector<8x8xf32>
    %c0_14 = arith.constant 0 : index
    %c0_15 = arith.constant 0 : index
    %24 = vector.load %arg7[%c0_14, %c0_15] : memref<8x256xf32, #tpu.memory_space<vmem>>, vector<8x256xf32>
    %cst_16 = arith.constant dense<0.000000e+00> : vector<8x256xf32>
    %25 = tpu.matmul %23, %24, %cst_16 {dimension_numbers = #tpu.dot_dimension_numbers<[1], [0], [0], [1], [0, 0, 1, 1], [], []>} : vector<8x8xf32>, vector<8x256xf32>, vector<8x256xf32> -> vector<8x256xf32>
    %26 = arith.mulf %0, %25 : vector<8x256xf32>
    %c0_17 = arith.constant 0 : index
    %c0_18 = arith.constant 0 : index
    %27 = vector.load %arg8[%c0_17, %c0_18] : memref<256x32xf32, #tpu.memory_space<vmem>>, vector<256x32xf32>
    %cst_19 = arith.constant dense<0.000000e+00> : vector<8x32xf32>
    %28 = tpu.matmul %26, %27, %cst_19 {dimension_numbers = #tpu.dot_dimension_numbers<[1], [0], [0], [1], [0, 0, 1, 1], [], []>} : vector<8x256xf32>, vector<256x32xf32>, vector<8x32xf32> -> vector<8x32xf32>
    %c0_20 = arith.constant 0 : index
    %c0_21 = arith.constant 0 : index
    %29 = vector.load %arg9[%c0_20, %c0_21] : memref<8x32xf32, #tpu.memory_space<vmem>>, vector<8x32xf32>
    tpu.vector_store %arg9[%c0_20, %c0_21], %28 {strides = array<i32>} : memref<8x32xf32, #tpu.memory_space<vmem>>, vector<8x32xf32>,
    %c0_22 = arith.constant 0 : index
    %c0_23 = arith.constant 0 : index
    %30 = vector.load %arg10[%c0_22, %c0_23] : memref<8x8xf32, #tpu.memory_space<vmem>>, vector<8x8xf32>
    tpu.vector_store %arg10[%c0_22, %c0_23], %23 {strides = array<i32>} : memref<8x8xf32, #tpu.memory_space<vmem>>, vector<8x8xf32>,
    return
  }
  func.func @transform_0(%arg0: i32) -> (i32, i32) {
    %c0_i32 = arith.constant 0 : i32
    %c0_i32_0 = arith.constant 0 : i32
    return %arg0, %c0_i32 : i32, i32
  }
  func.func @transform_1(%arg0: i32) -> (i32, i32) {
    %c0_i32 = arith.constant 0 : i32
    %c0_i32_0 = arith.constant 0 : i32
    %c0_i32_1 = arith.constant 0 : i32
    return %c0_i32, %c0_i32_0 : i32, i32
  }
  func.func @transform_2(%arg0: i32) -> (i32, i32) {
    %c0_i32 = arith.constant 0 : i32
    %c0_i32_0 = arith.constant 0 : i32
    %c0_i32_1 = arith.constant 0 : i32
    return %c0_i32, %c0_i32_0 : i32, i32
  }
  func.func @transform_3(%arg0: i32) -> (i32, i32) {
    %c0_i32 = arith.constant 0 : i32
    %c0_i32_0 = arith.constant 0 : i32
    %c0_i32_1 = arith.constant 0 : i32
    return %c0_i32, %c0_i32_0 : i32, i32
  }
  func.func @transform_4(%arg0: i32) -> (i32, i32) {
    %c0_i32 = arith.constant 0 : i32
    %c0_i32_0 = arith.constant 0 : i32
    %c0_i32_1 = arith.constant 0 : i32
    return %c0_i32, %c0_i32_0 : i32, i32
  }
  func.func @transform_5(%arg0: i32) -> (i32, i32) {
    %c0_i32 = arith.constant 0 : i32
    %c0_i32_0 = arith.constant 0 : i32
    %c0_i32_1 = arith.constant 0 : i32
    return %c0_i32, %c0_i32_0 : i32, i32
  }
  func.func @transform_6(%arg0: i32) -> (i32, i32) {
    %c0_i32 = arith.constant 0 : i32
    %c0_i32_0 = arith.constant 0 : i32
    %c0_i32_1 = arith.constant 0 : i32
    return %c0_i32, %c0_i32_0 : i32, i32
  }
  func.func @transform_7(%arg0: i32) -> (i32, i32) {
    %c0_i32 = arith.constant 0 : i32
    %c0_i32_0 = arith.constant 0 : i32
    %c0_i32_1 = arith.constant 0 : i32
    return %c0_i32, %c0_i32_0 : i32, i32
  }
  func.func @transform_8(%arg0: i32) -> (i32, i32) {
    %c0_i32 = arith.constant 0 : i32
    %c0_i32_0 = arith.constant 0 : i32
    return %arg0, %c0_i32 : i32, i32
  }
  func.func @transform_9(%arg0: i32) -> (i32, i32) {
    %c0_i32 = arith.constant 0 : i32
    %c0_i32_0 = arith.constant 0 : i32
    return %arg0, %c0_i32 : i32, i32
  }
}

</mosaic_0001>

<bundles_post_ra>
// kernel: tpu_custom_call.1
= control target key start
LH: loop header
LB: loop body
LE: loop exit
PB: predicated region body
PF: predicated region fallthrough
CT: control target
= control target key end

     0   :  { %15 = vsyncpa [#allocation3], 0  ;;  %s1200_s0 = inlined_call_operand.vmem [shape: f32[8,256], index: 0, kind: input, shape index: {}]   ;;  %s1201_s1 = inlined_call_operand.vmem [shape: f32[256,256], index: 1, kind: input, shape index: {}]   ;;  %s1202_s2 = inlined_call_operand.vmem [shape: f32[1,256], index: 2, kind: input, shape index: {}]   ;;  %s1203_s3 = inlined_call_operand.hbm [shape: f32[1,256], index: 3, kind: input, shape index: {}]   ;;  %s1204_s4 = inlined_call_operand.vmem [shape: f32[1,8], index: 4, kind: input, shape index: {}]   ;;  %s1205_s5 = inlined_call_operand.vmem [shape: f32[256,8], index: 5, kind: input, shape index: {}]   ;;  %s1206_s6 = inlined_call_operand.hbm [shape: f32[8,256], index: 6, kind: input, shape index: {}]   ;;  %s1207_s7 = inlined_call_operand.vmem [shape: f32[256,32], index: 7, kind: input, shape index: {}]   ;;  %s1208_s8 = inlined_call_operand.hbm [shape: f32[8,32], index: 8, kind: output, shape index: {0}]   ;;  %s1209_s9 = inlined_call_operand.hbm [shape: f32[8,8], index: 9, kind: output, shape index: {1}]  }
   0x1   :  { %16 = vsyncpa [#allocation6], 0 }
   0x2   :  { %17 = vsyncpa [#allocation4], 0 }
   0x3   :  { %18 = vsyncpa [#allocation9], 0  ;;  %s725_s30 = smov [#allocation2]   ;;  %s726_s11 = smov [#allocation5]  }
   0x4   :  { %s31_s10 = sshll.u32 %s725_s30, 4  ;;  %s45_s12 = sshll.u32 %s726_s11, 4  ;;  %s32_s10 = int_to_ptr.vmem [resolvable:$true] %s31_s10  ;;  %s46_s12 = int_to_ptr.vmem [resolvable:$true] %s45_s12 }
   0x5   :  { %s645_s13 = scalar_lea.vmem %s32_s10, 32  ;;  %p650_p1 = scmp.lt.s32.totalorder %s32_s10, %s32_s10 }
   0x6   :  { %p646_p0 = scmp.ne.s32.totalorder %s32_s10, %s645_s13  ;;  %p651_p2 = scmp.lt.s32.totalorder %s645_s13, %s645_s13 }
   0x8   :  { %p652_p3 = por %p651_p2, %p650_p1 }
   0xa   :  { %p653_p4 = pnand %p652_p3, %p646_p0 }
   0xc   :  { %656 = shalt.err (!%p653_p4)
}
   0xd   :  { %34 = dma.hbm_to_vmem [thread:$0]  %s1203_s3, 32, %s32_s10, [#allocation3]  }
   0xe   :  { %s665_s16 = scalar_lea.vmem %s46_s12, 256  ;;  %p670_p6 = scmp.lt.s32.totalorder %s46_s12, %s46_s12 }
   0xf   :  { %p666_p5 = scmp.ne.s32.totalorder %s46_s12, %s665_s16  ;;  %p671_p7 = scmp.lt.s32.totalorder %s665_s16, %s665_s16 }
  0x11   :  { %p672_p8 = por %p671_p7, %p670_p6 }
  0x13   :  { %p673_p9 = pnand %p672_p8, %p666_p5 }
  0x15   :  { %676 = shalt.err (!%p673_p9)
}
  0x16   :  { %48 = dma.hbm_to_vmem [thread:$0]  %s1206_s6, 256, %s46_s12, [#allocation6]  }
  0x17   :  { %717 = dma.done.wait [#allocation3], 32  }
  0x18   :  { %718 = vsyncadd [#allocation3], 4294967264 }
  0x19   :  { %719 = dma.done.wait [#allocation6], 256  }
  0x1a   :  { %720 = vsyncadd [#allocation6], 4294967040  ;;  %v90_v0 = vld [vmem:[%s1201_s1 + $0xf8] sm:$0xff]  ;;  %v89_v1 = vld [vmem:[%s1201_s1 + $0xf0] sm:$0xff]  ;;  %vm343_vm0 = vcmask 64512   ;;  %s728_s15 = smov [#allocation8]  }
  0x1b   :  { %v88_v2 = vld [vmem:[%s1201_s1 + $0xe8] sm:$0xff]  ;;  %135 = vmatprep.subr.mxu0 %v90_v0  ;;  %v87_v3 = vld [vmem:[%s1201_s1 + $0xe0] sm:$0xff]  ;;  %v86_v4 = vld [vmem:[%s1201_s1 + $0xd8] sm:$0xff]  ;;  %s541_s16 = sshll.u32 %s728_s15, 4  ;;  %s542_s16 = int_to_ptr.vmem [resolvable:$true] %s541_s16 }
  0x1c   :  { %136 = vmatpush1.msra.mxu0 %v89_v1  ;;  %v85_v5 = vld [vmem:[%s1201_s1 + $0xd0] sm:$0xff]  ;;  %v84_v6 = vld [vmem:[%s1201_s1 + $0xc8] sm:$0xff]  ;;  %v83_v7 = vld [vmem:[%s1201_s1 + $0xc0] sm:$0xff]  ;;  %s677_s17 = scalar_lea.vmem %s542_s16, 128  ;;  %p682_p11 = scmp.lt.s32.totalorder %s542_s16, %s542_s16 }
  0x1d   :  { %137 = vmatprep.subr.mxu0 %v88_v2  ;;  %v82_v8 = vld [vmem:[%s1201_s1 + $0xb8] sm:$0xff]  ;;  %v81_v9 = vld [vmem:[%s1201_s1 + $0xb0] sm:$0xff]  ;;  %v80_v10 = vld [vmem:[%s1201_s1 + $0xa8] sm:$0xff]  ;;  %p678_p10 = scmp.ne.s32.totalorder %s542_s16, %s677_s17  ;;  %p683_p12 = scmp.lt.s32.totalorder %s677_s17, %s677_s17 }
  0x1e   :  { %138 = vmatpush1.msra.mxu0 %v87_v3  ;;  %v79_v11 = vld [vmem:[%s1201_s1 + $0xa0] sm:$0xff]  ;;  %v78_v12 = vld [vmem:[%s1201_s1 + $0x98] sm:$0xff]  ;;  %v77_v13 = vld [vmem:[%s1201_s1 + $0x90] sm:$0xff] }
  0x1f   :  { %139 = vmatprep.subr.mxu0 %v86_v4  ;;  %v76_v14 = vld [vmem:[%s1201_s1 + $0x88] sm:$0xff]  ;;  %v75_v15 = vld [vmem:[%s1201_s1 + $0x80] sm:$0xff]  ;;  %v74_v16 = vld [vmem:[%s1201_s1 + $0x78] sm:$0xff]  ;;  %p684_p13 = por %p683_p12, %p682_p11 }
  0x20   :  { %140 = vmatpush1.msra.mxu0 %v85_v5  ;;  %v73_v17 = vld [vmem:[%s1201_s1 + $0x70] sm:$0xff]  ;;  %v72_v18 = vld [vmem:[%s1201_s1 + $0x68] sm:$0xff]  ;;  %v71_v19 = vld [vmem:[%s1201_s1 + $0x60] sm:$0xff] }
  0x21   :  { %141 = vmatprep.subr.mxu0 %v84_v6  ;;  %v70_v20 = vld [vmem:[%s1201_s1 + $0x58] sm:$0xff]  ;;  %v69_v21 = vld [vmem:[%s1201_s1 + $0x50] sm:$0xff]  ;;  %v68_v22 = vld [vmem:[%s1201_s1 + $0x48] sm:$0xff]  ;;  %p685_p0 = pnand %p684_p13, %p678_p10 }
  0x22   :  { %142 = vmatpush1.msra.mxu0 %v83_v7  ;;  %v67_v23 = vld [vmem:[%s1201_s1 + $0x40] sm:$0xff]  ;;  %v66_v24 = vld [vmem:[%s1201_s1 + $0x38] sm:$0xff]  ;;  %v864_v25 = vld [vmem:[%s1200_s0 + $0x8] sm:$0xff] }
  0x23   :  { %143 = vmatprep.subr.mxu0 %v82_v8  ;;  %199 = vmatprep.mubr.f32.mxu0 %v864_v25  ;;  %v256_v26 = vld [vmem:[%s1205_s5 + $0xf8] sm:$0xff]  ;;  %v255_v28 = vld [vmem:[%s1205_s5 + $0xf0] sm:$0xff]  ;;  %v64_v31 = vld [vmem:[%s1201_s1 + $0x28] sm:$0xff] }
  0x24   :  { %144 = vmatpush1.msra.mxu0 %v81_v9  ;;  %v240_v27 = vld [vmem:[%s1205_s5 + $0x78] sm:$0xff]  ;;  %v65_v29 = vld [vmem:[%s1201_s1 + $0x30] sm:$0xff]  ;;  %558 = vmatprep.subr.mxu1 %v256_v26  ;;  %v254_v32 = vld [vmem:[%s1205_s5 + $0xe8] sm:$0xff] }
  0x25   :  { %145 = vmatprep.subr.mxu0 %v80_v10  ;;  %v239_v30 = vld [vmem:[%s1205_s5 + $0x70] sm:$0xff]  ;;  %559 = vmatpush3.msra.mxu1 %v240_v27  ;;  %v63_v33 = vld [vmem:[%s1201_s1 + $0x20] sm:$0xff]  ;;  %v238_v34 = vld [vmem:[%s1205_s5 + $0x68] sm:$0xff]  ;;  %v125_v27 = vlaneseq }
  0x26   :  { %146 = vmatpush1.msra.mxu0 %v79_v11  ;;  %560 = vmatprep.subr.mxu1 %v255_v28  ;;  %v62_v35 = vld [vmem:[%s1201_s1 + $0x18] sm:$0xff]  ;;  %v253_v36 = vld [vmem:[%s1205_s5 + $0xe0] sm:$0xff]  ;;  %v61_v37 = vld [vmem:[%s1201_s1 + $0x10] sm:$0xff] }
  0x27   :  { %147 = vmatprep.subr.mxu0 %v78_v12  ;;  %561 = vmatpush3.msra.mxu1 %v239_v30  ;;  %v237_v38 = vld [vmem:[%s1205_s5 + $0x60] sm:$0xff]  ;;  %v60_v39 = vld [vmem:[%s1201_s1 + $0x8] sm:$0xff]  ;;  %v252_v40 = vld [vmem:[%s1205_s5 + $0xd8] sm:$0xff] }
  0x28   :  { %148 = vmatpush1.msra.mxu0 %v77_v13  ;;  %562 = vmatprep.subr.mxu1 %v254_v32  ;;  %v59_v41 = vld [vmem:[%s1201_s1] sm:$0xff]  ;;  %v236_v42 = vld [vmem:[%s1205_s5 + $0x58] sm:$0xff]  ;;  %v251_v44 = vld [vmem:[%s1205_s5 + $0xd0] sm:$0xff]  ;;  %v126_v32 = vshrl.u32 %v125_v27, 7 }
  0x29   :  { %149 = vmatprep.subr.mxu0 %v76_v14  ;;  %563 = vmatpush3.msra.mxu1 %v238_v34  ;;  %v122_v43 = vld [vmem:[%s1201_s1 + $0x1f8] sm:$0xff]  ;;  %v121_v45 = vld [vmem:[%s1201_s1 + $0x1f0] sm:$0xff]  ;;  %v120_v47 = vld [vmem:[%s1201_s1 + $0x1e8] sm:$0xff] }
  0x2a   :  { %150 = vmatpush1.msra.mxu0 %v75_v15  ;;  %564 = vmatprep.subr.mxu1 %v253_v36  ;;  %v235_v46 = vld [vmem:[%s1205_s5 + $0x50] sm:$0xff]  ;;  %v250_v48 = vld [vmem:[%s1205_s5 + $0xc8] sm:$0xff]  ;;  %v119_v49 = vld [vmem:[%s1201_s1 + $0x1e0] sm:$0xff] }
  0x2b   :  { %151 = vmatprep.subr.mxu0 %v74_v16  ;;  %565 = vmatpush3.msra.mxu1 %v237_v38  ;;  %v234_v50 = vld [vmem:[%s1205_s5 + $0x48] sm:$0xff]  ;;  %v118_v51 = vld [vmem:[%s1201_s1 + $0x1d8] sm:$0xff]  ;;  %v249_v52 = vld [vmem:[%s1205_s5 + $0xc0] sm:$0xff]  ;;  %v131_v38 = vsub.s32 1, %v126_v32 }
  0x2c   :  { %152 = vmatpush1.msra.mxu0 %v73_v17  ;;  %566 = vmatprep.subr.mxu1 %v252_v40  ;;  %v117_v53 = vld [vmem:[%s1201_s1 + $0x1d0] sm:$0xff]  ;;  %v233_v54 = vld [vmem:[%s1205_s5 + $0x40] sm:$0xff]  ;;  %v116_v55 = vld [vmem:[%s1201_s1 + $0x1c8] sm:$0xff] }
  0x2d   :  { %153 = vmatprep.subr.mxu0 %v72_v18  ;;  %567 = vmatpush3.msra.mxu1 %v236_v42  ;;  %v248_v56 = vld [vmem:[%s1205_s5 + $0xb8] sm:$0xff]  ;;  %v115_v57 = vld [vmem:[%s1201_s1 + $0x1c0] sm:$0xff]  ;;  %v247_v60 = vld [vmem:[%s1205_s5 + $0xb0] sm:$0xff] }
  0x2e   :  { %154 = vmatpush1.msra.mxu0 %v71_v19  ;;  %568 = vmatprep.subr.mxu1 %v251_v44  ;;  %v232_v58 = vld [vmem:[%s1205_s5 + $0x38] sm:$0xff]  ;;  %v113_v61 = vld [vmem:[%s1201_s1 + $0x1b0] sm:$0xff]  ;;  %v112_v63 = vld [vmem:[%s1201_s1 + $0x1a8] sm:$0xff] }
  0x2f   :  { %155 = vmatprep.subr.mxu0 %v70_v20  ;;  %569 = vmatpush3.msra.mxu1 %v235_v46  ;;  %v114_v59 = vld [vmem:[%s1201_s1 + $0x1b8] sm:$0xff]  ;;  %v231_v62 = vld [vmem:[%s1205_s5 + $0x30] sm:$0xff]  ;;  %v246_v0 = vld [vmem:[%s1205_s5 + $0xa8] sm:$0xff] }
  0x30   :  { %156 = vmatpush1.msra.mxu0 %v69_v21  ;;  %570 = vmatprep.subr.mxu1 %v250_v48  ;;  %v111_v1 = vld [vmem:[%s1201_s1 + $0x1a0] sm:$0xff]  ;;  %v230_v2 = vld [vmem:[%s1205_s5 + $0x28] sm:$0xff]  ;;  %v110_v3 = vld [vmem:[%s1201_s1 + $0x198] sm:$0xff] }
  0x31   :  { %157 = vmatprep.subr.mxu0 %v68_v22  ;;  %571 = vmatpush3.msra.mxu1 %v234_v50  ;;  %v245_v4 = vld [vmem:[%s1205_s5 + $0xa0] sm:$0xff]  ;;  %v109_v5 = vld [vmem:[%s1201_s1 + $0x190] sm:$0xff]  ;;  %v108_v7 = vld [vmem:[%s1201_s1 + $0x188] sm:$0xff] }
  0x32   :  { %158 = vmatpush1.msra.mxu0 %v67_v23  ;;  %572 = vmatprep.subr.mxu1 %v249_v52  ;;  %v229_v6 = vld [vmem:[%s1205_s5 + $0x20] sm:$0xff]  ;;  %v106_v9 = vld [vmem:[%s1201_s1 + $0x178] sm:$0xff]  ;;  %v105_v10 = vld [vmem:[%s1201_s1 + $0x170] sm:$0xff] }
  0x33   :  { %159 = vmatprep.subr.mxu0 %v66_v24  ;;  %573 = vmatpush3.msra.mxu1 %v233_v54  ;;  %v107_v8 = vld [vmem:[%s1201_s1 + $0x180] sm:$0xff]  ;;  %v104_v11 = vld [vmem:[%s1201_s1 + $0x168] sm:$0xff]  ;;  %v102_v13 = vld [vmem:[%s1201_s1 + $0x158] sm:$0xff] }
  0x34   :  { %160 = vmatpush1.msra.mxu0 %v65_v29  ;;  %574 = vmatprep.subr.mxu1 %v248_v56  ;;  %v103_v12 = vld [vmem:[%s1201_s1 + $0x160] sm:$0xff]  ;;  %v101_v14 = vld [vmem:[%s1201_s1 + $0x150] sm:$0xff]  ;;  %v100_v15 = vld [vmem:[%s1201_s1 + $0x148] sm:$0xff]  ;;  %v727_v56 = vmov 0.0  }
  0x35   :  { %161 = vmatprep.subr.mxu0 %v64_v31  ;;  %575 = vmatpush3.msra.mxu1 %v232_v58  ;;  %v99_v16 = vld [vmem:[%s1201_s1 + $0x140] sm:$0xff]  ;;  %v98_v17 = vld [vmem:[%s1201_s1 + $0x138] sm:$0xff]  ;;  %v97_v18 = vld [vmem:[%s1201_s1 + $0x130] sm:$0xff] }
  0x36   :  { %162 = vmatpush1.msra.mxu0 %v63_v33  ;;  %576 = vmatprep.subr.mxu1 %v247_v60  ;;  %v96_v19 = vld [vmem:[%s1201_s1 + $0x128] sm:$0xff]  ;;  %v95_v20 = vld [vmem:[%s1201_s1 + $0x120] sm:$0xff]  ;;  %v94_v21 = vld [vmem:[%s1201_s1 + $0x118] sm:$0xff] }
  0x37   :  { %163 = vmatprep.subr.mxu0 %v62_v35  ;;  %577 = vmatpush3.msra.mxu1 %v231_v62  ;;  %v93_v22 = vld [vmem:[%s1201_s1 + $0x110] sm:$0xff]  ;;  %v92_v23 = vld [vmem:[%s1201_s1 + $0x108] sm:$0xff]  ;;  %v91_v24 = vld [vmem:[%s1201_s1 + $0x100] sm:$0xff] }
  0x38   :  { %164 = vmatpush1.msra.mxu0 %v61_v37  ;;  %578 = vmatprep.subr.mxu1 %v246_v0  ;;  %v1059_v26 = vld [vmem:[%s1200_s0] sm:$0xff]  ;;  %v244_v28 = vld [vmem:[%s1205_s5 + $0x98] sm:$0xff]  ;;  %v243_v30 = vld [vmem:[%s1205_s5 + $0x90] sm:$0xff]  ;;  %v127_v37 = vsub.s32 0, %v126_v32 }
  0x39   :  { %165 = vmatprep.subr.mxu0 %v60_v39  ;;  %579 = vmatpush3.msra.mxu1 %v230_v2  ;;  %v228_v29 = vld [vmem:[%s1205_s5 + $0x18] sm:$0xff]  ;;  %v227_v31 = vld [vmem:[%s1205_s5 + $0x10] sm:$0xff]  ;;  %v242_v33 = vld [vmem:[%s1205_s5 + $0x88] sm:$0xff] }
  0x3a   :  { %166 = vmatpush1.msra.mxu0 %v59_v41  ;;  %580 = vmatprep.subr.mxu1 %v245_v4  ;;  %v226_v34 = vld [vmem:[%s1205_s5 + $0x8] sm:$0xff]  ;;  %v241_v35 = vld [vmem:[%s1205_s5 + $0x80] sm:$0xff]  ;;  %v435_v4 = vld [vmem:[%s1207_s7 + $0x78] sm:$0xff] }
  0x3b   :  { %167 = vmatprep.subr.mxu0 %v122_v43  ;;  %581 = vmatpush3.msra.mxu1 %v229_v6  ;;  %v225_v36 = vld [vmem:[%s1205_s5] sm:$0xff]  ;;  %v342_v54 = vld [vmem:[#allocation5 + $0x8] sm:$0xff] }
  0x3c   :  { %168 = vmatpush2.msra.mxu0 %v121_v45  ;;  %582 = vmatprep.subr.mxu1 %v244_v28  ;;  %v206_v39 = vld [vmem:[#allocation2] sm:$0x3]  ;;  %v450_v6 = vld [vmem:[%s1207_s7 + $0xf0] sm:$0xff]  ;;  %v425_v27 = vld [vmem:[%s1207_s7 + $0x28] sm:$0xff] }
  0x3d   :  { %169 = vmatprep.subr.mxu0 %v120_v47  ;;  %583 = vmatpush3.msra.mxu1 %v228_v29  ;;  %v211_v40 = vrot.slane %v206_v39, %v127_v37  ;;  %v215_v41 = vrot.slane %v206_v39, %v131_v38  ;;  %v123_v45 = vld [vmem:[%s1202_s2] sm:$0x3]  ;;  %v438_v32 = vld [vmem:[%s1207_s7 + $0x90] sm:$0xff] }
  0x3e   :  { %170 = vmatpush2.msra.mxu0 %v119_v49  ;;  %584 = vmatprep.subr.mxu1 %v243_v30  ;;  %v128_v46 = vrot.slane %v123_v45, %v127_v37  ;;  %v132_v47 = vrot.slane %v123_v45, %v131_v38  ;;  %v555_v62 = vld [vmem:[%s1204_s4] ss:$0 sm:$0xff]  ;;  %v439_v30 = vld [vmem:[%s1207_s7 + $0x98] sm:$0xff] }
  0x3f   :  { %171 = vmatprep.subr.mxu0 %v118_v51  ;;  %585 = vmatpush3.msra.mxu1 %v227_v31  ;;  %v218_v42 = vmul.f32 %v211_v40, %v1059_v26  ;;  %v219_v43 = vmul.f32 %v215_v41, %v864_v25  ;;  %v440_v28 = vld [vmem:[%s1207_s7 + $0xa0] sm:$0xff]  ;;  %v423_v31 = vld [vmem:[%s1207_s7 + $0x18] sm:$0xff] }
  0x40   :  { %172 = vmatpush2.msra.mxu0 %v117_v53  ;;  %586 = vmatprep.subr.mxu1 %v242_v33  ;;  %v424_v29 = vld [vmem:[%s1207_s7 + $0x20] sm:$0xff]  ;;  %v422_v33 = vld [vmem:[%s1207_s7 + $0x10] sm:$0xff] }
  0x41   :  { %173 = vmatprep.subr.mxu0 %v116_v55  ;;  %587 = vmatpush3.msra.mxu1 %v226_v34  ;;  %v220_v44 = vadd.f32 %v219_v43, %v218_v42  ;;  %v341_v55 = vld [vmem:[#allocation5] sm:$0xff] }
  0x42   :  { %174 = vmatpush2.msra.mxu0 %v115_v57  ;;  %588 = vmatprep.subr.mxu1 %v241_v35  ;;  %v451_v57 = vld [vmem:[%s1207_s7 + $0xf8] sm:$0xff]  ;;  %v437_v34 = vld [vmem:[%s1207_s7 + $0x88] sm:$0xff]  ;;  %v420_v37 = vld [vmem:[%s1207_s7] sm:$0xff] }
  0x43   :  { %175 = vmatprep.subr.mxu0 %v114_v59  ;;  %589 = vmatpush3.msra.mxu1 %v225_v36  ;;  %v421_v35 = vld [vmem:[%s1207_s7 + $0x8] sm:$0xff]  ;;  %v436_v36 = vld [vmem:[%s1207_s7 + $0x80] sm:$0xff] }
  0x44   :  { %176 = vmatpush2.msra.mxu0 %v113_v61  ;;  %221 = vadd.xlane.f32.xlu0 %v220_v44 }
  0x45   :  { %177 = vmatprep.subr.mxu0 %v112_v63  ;;  %377 = vmatprep.subr.mxu1 %v342_v54 }
  0x46   :  { %178 = vmatpush2.msra.mxu0 %v111_v1 }
  0x47   :  { %179 = vmatprep.subr.mxu0 %v110_v3 }
  0x48   :  { %180 = vmatpush2.msra.mxu0 %v109_v5 }
  0x49   :  { %181 = vmatprep.subr.mxu0 %v108_v7  ;;  %v434_v7 = vld [vmem:[%s1207_s7 + $0x70] sm:$0xff] }
  0x4a   :  { %182 = vmatpush2.msra.mxu0 %v107_v8  ;;  %v449_v8 = vld [vmem:[%s1207_s7 + $0xe8] sm:$0xff] }
  0x4b   :  { %183 = vmatprep.subr.mxu0 %v106_v9  ;;  %v433_v9 = vld [vmem:[%s1207_s7 + $0x68] sm:$0xff] }
  0x4c   :  { %184 = vmatpush2.msra.mxu0 %v105_v10  ;;  %v448_v10 = vld [vmem:[%s1207_s7 + $0xe0] sm:$0xff] }
  0x4d   :  { %185 = vmatprep.subr.mxu0 %v104_v11  ;;  %v432_v11 = vld [vmem:[%s1207_s7 + $0x60] sm:$0xff] }
  0x4e   :  { %186 = vmatpush2.msra.mxu0 %v103_v12  ;;  %v447_v12 = vld [vmem:[%s1207_s7 + $0xd8] sm:$0xff] }
  0x4f   :  { %187 = vmatprep.subr.mxu0 %v102_v13  ;;  %v431_v13 = vld [vmem:[%s1207_s7 + $0x58] sm:$0xff] }
  0x50   :  { %188 = vmatpush2.msra.mxu0 %v101_v14  ;;  %v446_v14 = vld [vmem:[%s1207_s7 + $0xd0] sm:$0xff] }
  0x51   :  { %189 = vmatprep.subr.mxu0 %v100_v15  ;;  %v430_v15 = vld [vmem:[%s1207_s7 + $0x50] sm:$0xff] }
  0x52   :  { %190 = vmatpush2.msra.mxu0 %v99_v16  ;;  %v445_v16 = vld [vmem:[%s1207_s7 + $0xc8] sm:$0xff] }
  0x53   :  { %191 = vmatprep.subr.mxu0 %v98_v17  ;;  %v429_v17 = vld [vmem:[%s1207_s7 + $0x48] sm:$0xff] }
  0x54   :  { %192 = vmatpush2.msra.mxu0 %v97_v18  ;;  %v444_v18 = vld [vmem:[%s1207_s7 + $0xc0] sm:$0xff] }
  0x55   :  { %193 = vmatprep.subr.mxu0 %v96_v19  ;;  %v428_v19 = vld [vmem:[%s1207_s7 + $0x40] sm:$0xff] }
  0x56   :  { %194 = vmatpush2.msra.mxu0 %v95_v20  ;;  %v443_v20 = vld [vmem:[%s1207_s7 + $0xb8] sm:$0xff] }
  0x57   :  { %195 = vmatprep.subr.mxu0 %v94_v21  ;;  %v427_v21 = vld [vmem:[%s1207_s7 + $0x38] sm:$0xff] }
  0x58   :  { %196 = vmatpush2.msra.mxu0 %v93_v22  ;;  %v442_v22 = vld [vmem:[%s1207_s7 + $0xb0] sm:$0xff] }
  0x59   :  { %197 = vmatprep.subr.mxu0 %v92_v23  ;;  %v426_v23 = vld [vmem:[%s1207_s7 + $0x30] sm:$0xff] }
  0x5a   :  { %198 = vmatpush2.msra.mxu0 %v91_v24  ;;  %v441_v24 = vld [vmem:[%s1207_s7 + $0xa8] sm:$0xff] }
  0x5b   :  { %200 = vmatmul.mubr.f32.vlgmr.msra.gmra.mxu0 %v1059_v26 }
  0xcd   :  { %v222_v60 = vpop.xlane.xlu0 %221 }
 0x11b   :  { %v201_v48 = vpop.f32.mrf.mxu0 }
 0x11c   :  { %v202_v49 = vadd.f32 %v201_v48, %v128_v46 }
 0x11d   :  { %v203_v50 = vpop.f32.mrf.mxu0 }
 0x11e   :  { %v204_v51 = vadd.f32 %v203_v50, %v132_v47  ;;  %v223_v53 = vmul.f32 %v202_v49, %v1059_v26 }
 0x120   :  { %v224_v52 = vmul.f32 %v204_v51, %v864_v25 }
 0x122   :  { %321 = vmatprep.mubr.f32.mxu1 %v224_v52 }
 0x123   :  { %322 = vmatmul.mubr.f32.vlgmr.msra.gmra.mxu1 %v223_v53 }
 0x124   :  { %411 = vmatprep.mubr.f32.mxu1 %v727_v56  ;;  %378 = vmatpush1.msra.mxu1 %v341_v55 }
 0x125   :  { %593 = vmatprep.subr.mxu1 %v451_v57 }
 0x1e3   :  { %v590_v58 = vpop.f32.mrf.mxu1 }
 0x1e5   :  { %v591_v59 = vpop.f32.mrf.mxu1 }
 0x1e6   :  { %v592_v61 = vadd.f32 %v591_v59, %v590_v58 }
 0x1e8   :  { %v324_v63 = vadd.f32 %v592_v61, %v222_v60 }
 0x1ea   :  { %v334_v0 = vadd.f32 %v555_v62, %v324_v63 }
 0x1ec   :  { %v556_v1 = vmul.f32 -1.442695, %v334_v0 }
 0x1ee   :  { %633 = vpow2.f32 %v556_v1 }
 0x1fb   :  { %v634_v2 = vpop.eup %633 }
 0x1fc   :  { %v338_v3 = vadd.f32 1.0, %v634_v2 }
 0x1fe   :  { %635 = vrcp.f32 %v338_v3 }
 0x20b   :  { %v636_v5 = vpop.eup %635 }
 0x20c   :  { %557 = vmatmul.mubr.msk.f32.vlgmr.msra.gmra.mxu1 %vm343_vm0, %v636_v5  ;;  %524 = vst.msk [vmem:[#allocation8] sm:$0xff] %vm343_vm0, %v636_v5 }
 0x20d   :  { %594 = vmatpush3.msra.mxu1 %v435_v4 }
 0x20e   :  { %595 = vmatprep.subr.mxu1 %v450_v6 }
 0x20f   :  { %596 = vmatpush3.msra.mxu1 %v434_v7 }
 0x210   :  { %597 = vmatprep.subr.mxu1 %v449_v8 }
 0x211   :  { %598 = vmatpush3.msra.mxu1 %v433_v9 }
 0x212   :  { %599 = vmatprep.subr.mxu1 %v448_v10 }
 0x213   :  { %600 = vmatpush3.msra.mxu1 %v432_v11 }
 0x214   :  { %601 = vmatprep.subr.mxu1 %v447_v12 }
 0x215   :  { %602 = vmatpush3.msra.mxu1 %v431_v13 }
 0x216   :  { %603 = vmatprep.subr.mxu1 %v446_v14 }
 0x217   :  { %604 = vmatpush3.msra.mxu1 %v430_v15 }
 0x218   :  { %605 = vmatprep.subr.mxu1 %v445_v16 }
 0x219   :  { %606 = vmatpush3.msra.mxu1 %v429_v17 }
 0x21a   :  { %607 = vmatprep.subr.mxu1 %v444_v18 }
 0x21b   :  { %608 = vmatpush3.msra.mxu1 %v428_v19 }
 0x21c   :  { %609 = vmatprep.subr.mxu1 %v443_v20 }
 0x21d   :  { %610 = vmatpush3.msra.mxu1 %v427_v21 }
 0x21e   :  { %611 = vmatprep.subr.mxu1 %v442_v22 }
 0x21f   :  { %612 = vmatpush3.msra.mxu1 %v426_v23 }
 0x220   :  { %613 = vmatprep.subr.mxu1 %v441_v24 }
 0x221   :  { %614 = vmatpush3.msra.mxu1 %v425_v27 }
 0x222   :  { %615 = vmatprep.subr.mxu1 %v440_v28 }
 0x223   :  { %616 = vmatpush3.msra.mxu1 %v424_v29 }
 0x224   :  { %617 = vmatprep.subr.mxu1 %v439_v30 }
 0x225   :  { %618 = vmatpush3.msra.mxu1 %v423_v31 }
 0x226   :  { %619 = vmatprep.subr.mxu1 %v438_v32 }
 0x227   :  { %620 = vmatpush3.msra.mxu1 %v422_v33 }
 0x228   :  { %621 = vmatprep.subr.mxu1 %v437_v34 }
 0x229   :  { %622 = vmatpush3.msra.mxu1 %v421_v35 }
 0x22a   :  { %623 = vmatprep.subr.mxu1 %v436_v36 }
 0x22b   :  { %624 = vmatpush3.msra.mxu1 %v420_v37 }
 0x2cc   :  { %v413_v38 = vpop.f32.mrf.mxu1 }
 0x2cd   :  { %v418_v41 = vmul.f32 %v413_v38, %v1059_v26 }
 0x2ce   :  { %v415_v39 = vpop.f32.mrf.mxu1 }
 0x2cf   :  { %v419_v40 = vmul.f32 %v415_v39, %v864_v25 }
 0x2d1   :  { %516 = vmatprep.mubr.f32.mxu1 %v419_v40 }
 0x2d2   :  { %517 = vmatmul.mubr.f32.vlgmr.msra.gmra.mxu1 %v418_v41 }
 0x2d3   :  { %688 = shalt.err (!%p685_p0)
}
 0x2d4   :  { %544 = dma.vmem_to_hbm [thread:$0]  %s542_s16, 128, %s1209_s9, [#allocation9]   ;;  %vm522_vm1 = vcmask 261120  }
 0x2d5   :  { %s729_s1 = smov [#allocation7]  }
 0x2d6   :  { %s531_s19 = sshll.u32 %s729_s1, 4  ;;  %s532_s19 = int_to_ptr.vmem [resolvable:$true] %s531_s19 }
 0x2d7   :  { %s697_s0 = scalar_lea.vmem %s532_s19, 128  ;;  %p702_p2 = scmp.lt.s32.totalorder %s532_s19, %s532_s19 }
 0x2d8   :  { %p698_p1 = scmp.ne.s32.totalorder %s532_s19, %s697_s0  ;;  %p703_p3 = scmp.lt.s32.totalorder %s697_s0, %s697_s0 }
 0x2da   :  { %p704_p4 = por %p703_p3, %p702_p2 }
 0x2dc   :  { %p705_p5 = pnand %p704_p4, %p698_p1 }
 0x392   :  { %v625_v42 = vpop.f32.mrf.mxu1 }
 0x394   :  { %v626_v25 = vpop.f32.mrf.mxu1 }
 0x395   :  { %v627_v26 = vadd.f32 %v626_v25, %v625_v42 }
 0x397   :  { %523 = vst.msk [vmem:[#allocation7] sm:$0xff] %vm522_vm1, %v627_v26 }
 0x398   :  { %708 = shalt.err (!%p705_p5)
}
 0x399   :  { %534 = dma.vmem_to_hbm [thread:$0]  %s532_s19, 128, %s1208_s8, [#allocation4]  }
 0x39a   :  { %721 = dma.done.wait [#allocation4], 128  }
 0x39b   :  { %722 = vsyncadd [#allocation4], 4294967168 }
 0x39c   :  { %723 = dma.done.wait [#allocation9], 128  }
 0x39d   :  { %724 = vsyncadd [#allocation9], 4294967168 }
 0x39e   :  { %551 = vsyncpa [#allocation3], 1 }
 0x39f   :  { %552 = vsyncpa [#allocation6], 1 }
 0x3a0   :  { %553 = vsyncpa [#allocation4], 1 }
 0x3a1   :  { %554 = vsyncpa [#allocation9], 1 }

</bundles_post_ra>
